<compile_context>
chip_gen: v5e
topology: v5e:2x2
jax: 0.10.0
libtpu: 0.0.40
codegen_flags: <defaults>
</compile_context>

<pallas_src>
import functools

import jax
import jax.numpy as jnp
import numpy as np
from jax.experimental import pallas as pl
from jax.experimental.pallas import tpu as pltpu


# ----------------------------------------------------------------------------
# Kernel
# ----------------------------------------------------------------------------
def _attention_kernel(feat_ref, dec_ref, wt_ref, bw_ref, ut_ref, bu_ref,
                      v_ref, ctx_ref, wts_ref, *, valid_l):
    BB, Lp, F = feat_ref.shape
    H = dec_ref.shape[1]

    feats = feat_ref[...]                                     # (BB, Lp, F) f32
    dec = dec_ref[...]                                        # (BB, H)     f32

    # ---- W(features): one (BB*Lp, F) @ (F, H) MXU matmul.
    # Lp % 8 == 0 (wrapper guarantees it), so this reshape is a pure sublane
    # re-label -- no relayout.  bf16 operands, f32 accumulation.
    feats2d = feats.reshape(BB * Lp, F)
    w = jnp.dot(feats2d.astype(jnp.bfloat16), wt_ref[...],
                preferred_element_type=jnp.float32)           # (BB*Lp, H)
    w = w.reshape(BB, Lp, H)

    # ---- U(decoder): (BB, H) @ (H, H), bf16 operands, f32 accumulation.
    u = jnp.dot(dec.astype(jnp.bfloat16), ut_ref[...],
                preferred_element_type=jnp.float32) + bu_ref[...]   # (BB, H)

    h = jnp.tanh(w + bw_ref[...] + u[:, None, :])             # (BB, Lp, H) f32

    # ---- scores: VPU multiply + lane (H) reduce, NOT an Hx1 MXU matmul.
    # bv is constant over L -> cancels exactly in the softmax -> dropped.
    s = jnp.sum(h * v_ref[...], axis=-1)                      # (BB, Lp), Lp on lanes

    # Mask padded L positions (zero-padded features still give finite scores).
    if Lp != valid_l:
        lane = jax.lax.broadcasted_iota(jnp.int32, (BB, Lp), 1)
        s = jnp.where(lane < valid_l, s, -jnp.inf)

    # ---- softmax over L (lane axis); EUP reciprocal for the denominator.
    m = jnp.max(s, axis=-1, keepdims=True)                    # (BB, 1)
    p = jnp.exp(s - m)                                        # (BB, Lp)
    denom = jnp.sum(p, axis=-1, keepdims=True)                # (BB, 1)
    wts = p * pl.reciprocal(denom, approx=True)               # (BB, Lp)

    # ---- context: batched MXU contraction over Lp (padded lanes have weight
    # exactly 0), avoiding a (BB, Lp, F) f32 temporary + XLU sublane reduce.
    ctx = jax.lax.dot_general(
        wts[:, None, :], feats,
        dimension_numbers=(((2,), (1,)), ((0,), (0,))),
        preferred_element_type=jnp.float32)[:, 0, :]          # (BB, F)

    ctx_ref[...] = ctx.astype(ctx_ref.dtype)
    wts_ref[...] = wts.astype(wts_ref.dtype)


# ----------------------------------------------------------------------------
# Wrapper
# ----------------------------------------------------------------------------
def _vmem_capacity_bytes():
    """Detected VMEM capacity; conservative (v7x, 64 MiB) fallback."""
    try:
        info = pltpu.get_tpu_info()
        cap = getattr(info, "vmem_capacity_bytes", None)
        if cap:
            return int(cap)
    except Exception:
        pass
    return 64 * 1024 * 1024


def _choose_batch_block(B, Lp, F, feat_cap_bytes, target_rows, block_b=None):
    """Pick the batch block BB and padded batch Bp (BB | Bp)."""
    if block_b is not None:
        bb = max(1, int(block_b))
    else:
        bb = max(1, target_rows // max(Lp, 1))
        # cap by a (double-buffered) feature-block byte budget
        bb = min(bb, max(1, feat_cap_bytes // max(1, 2 * Lp * F * 4)))
    bb = min(bb, B)
    # v7x has 2 TensorCores; give the 'parallel' batch axis >= 2 grid steps
    # whenever the batch allows it.
    if B > 1:
        bb = min(bb, pl.cdiv(B, 2))
    if bb < B:
        # Batch blocks must be sublane-legal: a multiple of 8 (f32 tile) unless
        # they span the whole (padded) batch.  Rebalance to minimize padding.
        bb8 = max(8, (bb // 8) * 8)
        n_steps = pl.cdiv(B, bb8)
        bb = pl.cdiv(pl.cdiv(B, n_steps), 8) * 8
    Bp = pl.cdiv(B, bb) * bb
    return bb, Bp


def _const2d(shape):
    # Constant-index block: single-buffer it; double-buffering a block whose
    # index never changes only burns VMEM (key on v7x's 64 MiB).
    return pl.BlockSpec(shape, lambda b: (0, 0), pipeline_mode=pl.Buffered(1))


def attention_pallas(features, decoder_output, params, *, block_b=None):
    """features: (B, L, F) f32, decoder_output: (B, H) f32
       -> (context (B, F), weights (B, L))."""
    B, L, F = features.shape
    H = decoder_output.shape[1]

    W_w, W_b, U_w, U_b, v_w, v_b = params
    del v_b  # constant over L -> cancels exactly in the softmax

    # Pre-transpose weights to (in, out); bf16 MXU operands in HBM.
    Wt = W_w.T.astype(jnp.bfloat16)               # (F, H)
    Ut = U_w.T.astype(jnp.bfloat16)               # (H, H)
    bW = W_b.reshape(1, H).astype(jnp.float32)
    bU = U_b.reshape(1, H).astype(jnp.float32)
    v_row = v_w.reshape(1, H).astype(jnp.float32)  # output_size == 1

    # ---- pad L to a sublane multiple so the in-kernel merge is layout-free.
    Lp = pl.cdiv(L, 8) * 8
    if Lp != L:
        features = jnp.pad(features, ((0, 0), (0, Lp - L), (0, 0)))

    # ---- generation-aware sizing (v5e/v6e: 128 MiB VMEM, v7x: 64 MiB).
    vmem_cap = _vmem_capacity_bytes()
    if vmem_cap >= 96 * 1024 * 1024:              # v5e / v6e
        feat_cap_bytes = 16 * 1024 * 1024
        vmem_limit = 64 * 1024 * 1024
        target_rows = 1024
    else:                                         # v7x
        feat_cap_bytes = 8 * 1024 * 1024
        vmem_limit = 48 * 1024 * 1024
        target_rows = 512

    BB, Bp = _choose_batch_block(B, Lp, F, feat_cap_bytes, target_rows, block_b)

    # Padded batch rows are independent (per-row softmax) and sliced off after.
    if Bp != B:
        features = jnp.pad(features, ((0, Bp - B), (0, 0), (0, 0)))
        decoder_output = jnp.pad(decoder_output, ((0, Bp - B), (0, 0)))

    grid = (Bp // BB,)
    kernel = functools.partial(_attention_kernel, valid_l=L)

    ctx, wts = pl.pallas_call(
        kernel,
        out_shape=(
            jax.ShapeDtypeStruct((Bp, F), jnp.float32),   # context (lane-dense)
            jax.ShapeDtypeStruct((Bp, Lp), jnp.float32),  # weights (lane-dense)
        ),
        grid_spec=pltpu.PrefetchScalarGridSpec(
            num_scalar_prefetch=0,
            grid=grid,
            in_specs=[
                pl.BlockSpec((BB, Lp, F), lambda b: (b, 0, 0)),  # features (streamed)
                pl.BlockSpec((BB, H), lambda b: (b, 0)),         # decoder_output
                _const2d((F, H)),                                # W^T (bf16)
                _const2d((1, H)),                                # bW
                _const2d((H, H)),                                # U^T (bf16)
                _const2d((1, H)),                                # bU
                _const2d((1, H)),                                # v row
            ],
            out_specs=[
                pl.BlockSpec((BB, F), lambda b: (b, 0)),
                pl.BlockSpec((BB, Lp), lambda b: (b, 0)),
            ],
        ),
        compiler_params=pltpu.CompilerParams(
            dimension_semantics=("parallel",),
            vmem_limit_bytes=vmem_limit,
        ),
    )(features, decoder_output, Wt, bW, Ut, bU, v_row)

    return ctx[:B], wts[:B, :L]


# ----------------------------------------------------------------------------
# Pure-JAX reference + params
# ----------------------------------------------------------------------------
def attention_reference(features, decoder_output, params):
    W_w, W_b, U_w, U_b, v_w, v_b = params
    dec = decoder_output[:, None, :]                       # (B, 1, H)
    w = features @ W_w.T + W_b                             # (B, L, H)
    u = dec @ U_w.T + U_b                                  # (B, 1, H)
    scores = jnp.tanh(w + u) @ v_w.T + v_b                 # (B, L, 1)
    weights = jax.nn.softmax(scores, axis=1)               # (B, L, 1)
    context = jnp.sum(weights * features, axis=1)          # (B, F)
    return context, weights[..., 0]


def make_params(key, features_size, hidden_size, output_size=1):
    ks = jax.random.split(key, 6)

    def lin(kw, kb, fan_in, fan_out):
        bound = 1.0 / np.sqrt(fan_in)
        w = jax.random.uniform(kw, (fan_out, fan_in), jnp.float32, -bound, bound)
        b = jax.random.uniform(kb, (fan_out,), jnp.float32, -bound, bound)
        return w, b

    W_w, W_b = lin(ks[0], ks[1], features_size, hidden_size)
    U_w, U_b = lin(ks[2], ks[3], hidden_size, hidden_size)
    v_w, v_b = lin(ks[4], ks[5], hidden_size, output_size)
    return (W_w, W_b, U_w, U_b, v_w, v_b)


if __name__ == "__main__":
    key = jax.random.PRNGKey(0)

    # Two shapes: L % 8 == 0 (no masking) and L % 8 != 0 + padded batch
    # (exercises the L-padding / -inf score-masking path).
    for (B, L, F, H) in [(2, 8, 32, 32), (3, 10, 32, 32)]:
        key, k_feat, k_dec, k_par = jax.random.split(key, 4)
        features = jax.random.normal(k_feat, (B, L, F), jnp.float32)
        decoder_output = jax.random.normal(k_dec, (B, H), jnp.float32)
        params = make_params(k_par, F, H, output_size=1)

        ctx, wts = attention_pallas(features, decoder_output, params)
        jax.block_until_ready((ctx, wts))

        ctx_ref, wts_ref = attention_reference(features, decoder_output, params)
        assert ctx.shape == (B, F) and wts.shape == (B, L)
        # bf16 MXU operands + approx softmax reciprocal: ~1e-2 relative drift
        # vs. the f32 reference (keep f32 operands / approx=False for exactness).
        np.testing.assert_allclose(np.asarray(ctx), np.asarray(ctx_ref),
                                    rtol=3e-2, atol=3e-2)
        np.testing.assert_allclose(np.asarray(wts), np.asarray(wts_ref),
                                    rtol=3e-2, atol=3e-2)

    print("KERNEL_OK")
</pallas_src>

<mosaic_0001>
module attributes {stable_mosaic.version = 11 : i64} {
  func.func @_attention_kernel(%arg0: i32, %arg1: memref<8x8x32xf32, #tpu.memory_space<vmem>>, %arg2: memref<8x32xf32, #tpu.memory_space<vmem>>, %arg3: memref<32x32xbf16, #tpu.memory_space<vmem>>, %arg4: memref<1x32xf32, #tpu.memory_space<vmem>>, %arg5: memref<32x32xbf16, #tpu.memory_space<vmem>>, %arg6: memref<1x32xf32, #tpu.memory_space<vmem>>, %arg7: memref<1x32xf32, #tpu.memory_space<vmem>>, %arg8: memref<8x32xf32, #tpu.memory_space<vmem>>, %arg9: memref<8x8xf32, #tpu.memory_space<vmem>>) attributes {dimension_semantics = [#tpu.dimension_semantics<parallel>], iteration_bounds = array<i64: 1>, scalar_prefetch = 0 : i64, scratch_operands = 0 : i64, tpu.core_type = #tpu.core_type<tc>, window_params = [{transform_indices = @transform_0, window_bounds = array<i64: 8, 8, 32>}, {transform_indices = @transform_1, window_bounds = array<i64: 8, 32>}, {pipeline_mode = #tpu.pipeline_mode<synchronous>, transform_indices = @transform_2, window_bounds = array<i64: 32, 32>}, {pipeline_mode = #tpu.pipeline_mode<synchronous>, transform_indices = @transform_3, window_bounds = array<i64: 1, 32>}, {pipeline_mode = #tpu.pipeline_mode<synchronous>, transform_indices = @transform_4, window_bounds = array<i64: 32, 32>}, {pipeline_mode = #tpu.pipeline_mode<synchronous>, transform_indices = @transform_5, window_bounds = array<i64: 1, 32>}, {pipeline_mode = #tpu.pipeline_mode<synchronous>, transform_indices = @transform_6, window_bounds = array<i64: 1, 32>}, {transform_indices = @transform_7, window_bounds = array<i64: 8, 32>}, {transform_indices = @transform_8, window_bounds = array<i64: 8, 8>}]} {
    %c0 = arith.constant 0 : index
    %c0_0 = arith.constant 0 : index
    %c0_1 = arith.constant 0 : index
    %0 = vector.load %arg1[%c0, %c0_0, %c0_1] : memref<8x8x32xf32, #tpu.memory_space<vmem>>, vector<8x8x32xf32>
    %c0_2 = arith.constant 0 : index
    %c0_3 = arith.constant 0 : index
    %1 = vector.load %arg2[%c0_2, %c0_3] : memref<8x32xf32, #tpu.memory_space<vmem>>, vector<8x32xf32>
    %2 = vector.shape_cast %0 : vector<8x8x32xf32> to vector<64x32xf32>
    %3 = arith.truncf %2 : vector<64x32xf32> to vector<64x32xbf16>
    %c0_4 = arith.constant 0 : index
    %c0_5 = arith.constant 0 : index
    %4 = vector.load %arg3[%c0_4, %c0_5] : memref<32x32xbf16, #tpu.memory_space<vmem>>, vector<32x32xbf16>
    %cst = arith.constant dense<0.000000e+00> : vector<64x32xf32>
    %5 = tpu.matmul %3, %4, %cst {dimension_numbers = #tpu.dot_dimension_numbers<[1], [0], [0], [1], [0, 0, 1, 1], [], []>} : vector<64x32xbf16>, vector<32x32xbf16>, vector<64x32xf32> -> vector<64x32xf32>
    %6 = vector.shape_cast %5 : vector<64x32xf32> to vector<8x8x32xf32>
    %7 = arith.truncf %1 : vector<8x32xf32> to vector<8x32xbf16>
    %c0_6 = arith.constant 0 : index
    %c0_7 = arith.constant 0 : index
    %8 = vector.load %arg5[%c0_6, %c0_7] : memref<32x32xbf16, #tpu.memory_space<vmem>>, vector<32x32xbf16>
    %cst_8 = arith.constant dense<0.000000e+00> : vector<8x32xf32>
    %9 = tpu.matmul %7, %8, %cst_8 {dimension_numbers = #tpu.dot_dimension_numbers<[1], [0], [0], [1], [0, 0, 1, 1], [], []>} : vector<8x32xbf16>, vector<32x32xbf16>, vector<8x32xf32> -> vector<8x32xf32>
    %c0_9 = arith.constant 0 : index
    %c0_10 = arith.constant 0 : index
    %10 = vector.load %arg6[%c0_9, %c0_10] : memref<1x32xf32, #tpu.memory_space<vmem>>, vector<1x32xf32>
    %11 = vector.broadcast %10 : vector<1x32xf32> to vector<8x32xf32>
    %12 = arith.addf %9, %11 : vector<8x32xf32>
    %c0_11 = arith.constant 0 : index
    %c0_12 = arith.constant 0 : index
    %13 = vector.load %arg4[%c0_11, %c0_12] : memref<1x32xf32, #tpu.memory_space<vmem>>, vector<1x32xf32>
    %14 = vector.shape_cast %13 : vector<1x32xf32> to vector<1x1x32xf32>
    %15 = vector.broadcast %14 : vector<1x1x32xf32> to vector<8x8x32xf32>
    %16 = arith.addf %6, %15 : vector<8x8x32xf32>
    %17 = vector.shape_cast %12 : vector<8x32xf32> to vector<8x1x32xf32>
    %18 = vector.broadcast %17 : vector<8x1x32xf32> to vector<8x8x32xf32>
    %19 = arith.addf %16, %18 : vector<8x8x32xf32>
    %20 = math.tanh %19 : vector<8x8x32xf32>
    %c0_13 = arith.constant 0 : index
    %c0_14 = arith.constant 0 : index
    %21 = vector.load %arg7[%c0_13, %c0_14] : memref<1x32xf32, #tpu.memory_space<vmem>>, vector<1x32xf32>
    %22 = vector.shape_cast %21 : vector<1x32xf32> to vector<1x1x32xf32>
    %23 = vector.broadcast %22 : vector<1x1x32xf32> to vector<8x8x32xf32>
    %24 = arith.mulf %20, %23 : vector<8x8x32xf32>
    %cst_15 = arith.constant dense<0.000000e+00> : vector<8x8xf32>
    %25 = vector.multi_reduction <add>, %24, %cst_15 [2] : vector<8x8x32xf32> to vector<8x8xf32>
    %cst_16 = arith.constant dense<0xFF800000> : vector<8xf32>
    %26 = vector.multi_reduction <maximumf>, %25, %cst_16 [1] : vector<8x8xf32> to vector<8xf32>
    %27 = vector.shape_cast %26 : vector<8xf32> to vector<8x1xf32>
    %28 = vector.broadcast %27 : vector<8x1xf32> to vector<8x8xf32>
    %29 = arith.subf %25, %28 : vector<8x8xf32>
    %30 = math.exp %29 : vector<8x8xf32>
    %cst_17 = arith.constant dense<0.000000e+00> : vector<8xf32>
    %31 = vector.multi_reduction <add>, %30, %cst_17 [1] : vector<8x8xf32> to vector<8xf32>
    %32 = vector.shape_cast %31 : vector<8xf32> to vector<8x1xf32>
    %33 = tpu.reciprocal %32 {approx = true} : vector<8x1xf32> -> vector<8x1xf32>
    %34 = vector.broadcast %33 : vector<8x1xf32> to vector<8x8xf32>
    %35 = arith.mulf %30, %34 : vector<8x8xf32>
    %36 = vector.shape_cast %35 : vector<8x8xf32> to vector<8x1x8xf32>
    %cst_18 = arith.constant dense<0.000000e+00> : vector<8x1x32xf32>
    %37 = tpu.matmul %36, %0, %cst_18 {dimension_numbers = #tpu.dot_dimension_numbers<[2], [1], [1], [2], [0, 0, 0, 1, 1, 2], [0], [0]>} : vector<8x1x8xf32>, vector<8x8x32xf32>, vector<8x1x32xf32> -> vector<8x1x32xf32>
    %38 = vector.shape_cast %37 : vector<8x1x32xf32> to vector<8x32xf32>
    %c0_19 = arith.constant 0 : index
    %c0_20 = arith.constant 0 : index
    %39 = vector.load %arg8[%c0_19, %c0_20] : memref<8x32xf32, #tpu.memory_space<vmem>>, vector<8x32xf32>
    tpu.vector_store %arg8[%c0_19, %c0_20], %38 {strides = array<i32>} : memref<8x32xf32, #tpu.memory_space<vmem>>, vector<8x32xf32>,
    %c0_21 = arith.constant 0 : index
    %c0_22 = arith.constant 0 : index
    %40 = vector.load %arg9[%c0_21, %c0_22] : memref<8x8xf32, #tpu.memory_space<vmem>>, vector<8x8xf32>
    tpu.vector_store %arg9[%c0_21, %c0_22], %35 {strides = array<i32>} : memref<8x8xf32, #tpu.memory_space<vmem>>, vector<8x8xf32>,
    return
  }
  func.func @transform_0(%arg0: i32) -> (i32, i32, i32) {
    %c0_i32 = arith.constant 0 : i32
    %c0_i32_0 = arith.constant 0 : i32
    %c0_i32_1 = arith.constant 0 : i32
    return %arg0, %c0_i32, %c0_i32_0 : i32, i32, i32
  }
  func.func @transform_1(%arg0: i32) -> (i32, i32) {
    %c0_i32 = arith.constant 0 : i32
    %c0_i32_0 = arith.constant 0 : i32
    return %arg0, %c0_i32 : i32, i32
  }
  func.func @transform_2(%arg0: i32) -> (i32, i32) {
    %c0_i32 = arith.constant 0 : i32
    %c0_i32_0 = arith.constant 0 : i32
    %c0_i32_1 = arith.constant 0 : i32
    return %c0_i32, %c0_i32_0 : i32, i32
  }
  func.func @transform_3(%arg0: i32) -> (i32, i32) {
    %c0_i32 = arith.constant 0 : i32
    %c0_i32_0 = arith.constant 0 : i32
    %c0_i32_1 = arith.constant 0 : i32
    return %c0_i32, %c0_i32_0 : i32, i32
  }
  func.func @transform_4(%arg0: i32) -> (i32, i32) {
    %c0_i32 = arith.constant 0 : i32
    %c0_i32_0 = arith.constant 0 : i32
    %c0_i32_1 = arith.constant 0 : i32
    return %c0_i32, %c0_i32_0 : i32, i32
  }
  func.func @transform_5(%arg0: i32) -> (i32, i32) {
    %c0_i32 = arith.constant 0 : i32
    %c0_i32_0 = arith.constant 0 : i32
    %c0_i32_1 = arith.constant 0 : i32
    return %c0_i32, %c0_i32_0 : i32, i32
  }
  func.func @transform_6(%arg0: i32) -> (i32, i32) {
    %c0_i32 = arith.constant 0 : i32
    %c0_i32_0 = arith.constant 0 : i32
    %c0_i32_1 = arith.constant 0 : i32
    return %c0_i32, %c0_i32_0 : i32, i32
  }
  func.func @transform_7(%arg0: i32) -> (i32, i32) {
    %c0_i32 = arith.constant 0 : i32
    %c0_i32_0 = arith.constant 0 : i32
    return %arg0, %c0_i32 : i32, i32
  }
  func.func @transform_8(%arg0: i32) -> (i32, i32) {
    %c0_i32 = arith.constant 0 : i32
    %c0_i32_0 = arith.constant 0 : i32
    return %arg0, %c0_i32 : i32, i32
  }
}

</mosaic_0001>

<bundles_post_ra>
// kernel: tpu_custom_call.1
= control target key start
LH: loop header
LB: loop body
LE: loop exit
PB: predicated region body
PF: predicated region fallthrough
CT: control target
= control target key end

     0   :  { %14 = vsyncpa [#allocation3], 0  ;;  %s1175_s0 = inlined_call_operand.hbm [shape: f32[8,8,32], index: 0, kind: input, shape index: {}]   ;;  %s1176_s1 = inlined_call_operand.hbm [shape: f32[8,32], index: 1, kind: input, shape index: {}]   ;;  %s1177_s2 = inlined_call_operand.hbm [shape: bf16[32,32], index: 2, kind: input, shape index: {}]   ;;  %s1178_s3 = inlined_call_operand.vmem [shape: f32[1,32], index: 3, kind: input, shape index: {}]   ;;  %s1179_s4 = inlined_call_operand.hbm [shape: bf16[32,32], index: 4, kind: input, shape index: {}]   ;;  %s1180_s5 = inlined_call_operand.vmem [shape: f32[1,32], index: 5, kind: input, shape index: {}]   ;;  %s1181_s6 = inlined_call_operand.vmem [shape: f32[1,32], index: 6, kind: input, shape index: {}]   ;;  %s1182_s7 = inlined_call_operand.hbm [shape: f32[8,32], index: 7, kind: output, shape index: {0}]   ;;  %s1183_s8 = inlined_call_operand.hbm [shape: f32[8,8], index: 8, kind: output, shape index: {1}]  }
   0x1   :  { %15 = vsyncpa [#allocation6], 0 }
   0x2   :  { %16 = vsyncpa [#allocation9], 0 }
   0x3   :  { %17 = vsyncpa [#allocation4], 0  ;;  %s37_s29 = sshll.u32 %s1176_s1, 4  ;;  %s38_s29 = int_to_ptr.hbm [resolvable:$true] %s37_s29 }
   0x4   :  { %18 = vsyncpa [#allocation12], 0  ;;  %s967_s30 = smov [#allocation5]   ;;  %s23_s12 = sshll.u32 %s1175_s0, 4  ;;  %s24_s12 = int_to_ptr.hbm [resolvable:$true] %s23_s12 }
   0x5   :  { %s39_s9 = sshll.u32 %s967_s30, 4  ;;  %s968_s13 = smov [#allocation2]   ;;  %s40_s9 = int_to_ptr.vmem [resolvable:$true] %s39_s9 }
   0x6   :  { %42 = dma.hbm_to_vmem [thread:$0]  %s38_s29, 128, %s40_s9, [#allocation6]  }
   0x7   :  { %s25_s14 = sshll.u32 %s968_s13, 4  ;;  %s969_s15 = smov 128   ;;  %s26_s14 = int_to_ptr.vmem [resolvable:$true] %s25_s14 }
   0x8   :  { %s970_s16 = smov 8   ;;  %s47_s1 = sshll.u32 %s1177_s2, 4  ;;  %s48_s1 = int_to_ptr.hbm [resolvable:$true] %s47_s1 }
   0x9   :  { %31 = dma.hbm_to_vmem [thread:$0]  %s24_s12, 1024, %s26_s14, [#allocation3], %s969_s15, %s969_s15, %s970_s16  }
   0xa   :  { %s971_s19 = smov [#allocation7]   ;;  %s62_s0 = sshll.u32 %s1179_s4, 4  ;;  %s63_s0 = int_to_ptr.hbm [resolvable:$true] %s62_s0 }
   0xb   :  { %s49_s20 = sshll.u32 %s971_s19, 4  ;;  %s972_s23 = smov 64   ;;  %s50_s20 = int_to_ptr.vmem [resolvable:$true] %s49_s20 }
   0xc   :  { %s973_s24 = smov 4   ;;  %s974_s25 = smov [#allocation8]  }
   0xd   :  { %55 = dma.hbm_to_vmem [thread:$0]  %s48_s1, 256, %s50_s20, [#allocation6], %s972_s23, %s972_s23, %s973_s24  }
   0xe   :  { %s64_s26 = sshll.u32 %s974_s25, 4  ;;  %s65_s26 = int_to_ptr.vmem [resolvable:$true] %s64_s26 }
   0xf   :  { %70 = dma.hbm_to_vmem [thread:$0]  %s63_s0, 256, %s65_s26, [#allocation9], %s972_s23, %s972_s23, %s973_s24  }
  0x10   :  { %957 = dma.done.wait [#allocation3], 1024  }
  0x11   :  { %958 = vsyncadd [#allocation3], 4294966272 }
  0x12   :  { %959 = dma.done.wait [#allocation6], 384  }
  0x13   :  { %960 = vsyncadd [#allocation6], 4294966912 }
  0x14   :  { %961 = dma.done.wait [#allocation9], 256  }
  0x15   :  { %962 = vsyncadd [#allocation9], 4294967040  ;;  %v757_v0 = vld [vmem:[#allocation7 + $0x8] sm:$0xff]  ;;  %v759_v1 = vld [vmem:[#allocation8 + $0x8] sm:$0xff]  ;;  %vm121_vm0 = vcmask 261120   ;;  %vm306_vm1 = vcmask 1041409  }
  0x16   :  { %v756_v2 = vld [vmem:[#allocation7] sm:$0xff]  ;;  %v758_v3 = vld [vmem:[#allocation8] sm:$0xff]  ;;  %140 = vmatpush.bf16.msra.mxu0 %v757_v0  ;;  %193 = vmatpush.bf16.msra.mxu1 %v759_v1  ;;  %v92_v4 = vld [vmem:[#allocation2] sm:$0xff]  ;;  %vm308_vm2 = vcmask 1042434   ;;  %vm310_vm3 = vcmask 1043459   ;;  %vm312_vm4 = vcmask 1044484  }
  0x17   :  { %v93_v5 = vld [vmem:[#allocation2 + $0x8] sm:$0xff]  ;;  %v100_v6 = vld [vmem:[#allocation5] sm:$0xff]  ;;  %760 = vmatpush.bf16.msra.mxu3 %v757_v0  ;;  %v98_v7 = vld [vmem:[#allocation2 + $0x30] sm:$0xff]  ;;  %465 = vmatpush.msra.mxu2 %v92_v4  ;;  %vm314_vm5 = vcmask 1045509   ;;  %vm316_vm6 = vcmask 1046534   ;;  %vm318_vm7 = vcmask 1047559  }
  0x18   :  { %v1035_v8 = vld [vmem:[#allocation2 + $0x38] sm:$0xff]  ;;  %v94_v9 = vld [vmem:[#allocation2 + $0x10] sm:$0xff]  ;;  %v101_v10 = vpack.c.bf16 %v93_v5, %v92_v4  ;;  %v163_v11 = vpack.c.bf16 %v100_v6, %v100_v6  ;;  %v1042_v15 = vld [vmem:[#allocation2 + $0x20] sm:$0xff]  ;;  %vm321_vm8 = vcmask 64512   ;;  %s710_s10 = sshll.u32 %s1183_s8, 4  ;;  %s977_s8 = smov [#allocation10]   ;;  %s711_s10 = int_to_ptr.hbm [resolvable:$true] %s710_s10 }
  0x19   :  { %519 = vmatpush.msrb.mxu2 %v94_v9  ;;  %v104_v12 = vpack.c.bf16 %v1035_v8, %v98_v7  ;;  %v95_v13 = vld [vmem:[#allocation2 + $0x18] sm:$0xff]  ;;  %v1044_v16 = vld [vmem:[#allocation2 + $0x28] sm:$0xff]  ;;  %v777_v18 = vld [vmem:[%s1180_s5] ss:$0 sm:$0xff]  ;;  %s697_s11 = sshll.u32 %s977_s8, 4  ;;  %s699_s14 = sshll.u32 %s1182_s7, 4  ;;  %s698_s11 = int_to_ptr.vmem [resolvable:$true] %s697_s11  ;;  %s700_s14 = int_to_ptr.hbm [resolvable:$true] %s699_s14 }
  0x1a   :  { %141 = vmatpush.bf16.msra.mxu0 %v756_v2  ;;  %194 = vmatpush.bf16.msra.mxu1 %v758_v3  ;;  %v102_v14 = vpack.c.bf16 %v95_v13, %v94_v9  ;;  %v103_v17 = vpack.c.bf16 %v1044_v16, %v1042_v15  ;;  %v1055_v19 = vld [vmem:[%s1178_s3] ss:$0 sm:$0xff] }
  0x1b   :  { %761 = vmatpush.bf16.msra.mxu3 %v756_v2  ;;  %v1068_v35 = vld [vmem:[%s1181_s6] ss:$0 sm:$0xff]  ;;  %s976_s6 = smov [#allocation11]  }
  0x1c   :  { %s708_s29 = sshll.u32 %s976_s6, 4  ;;  %s709_s29 = int_to_ptr.vmem [resolvable:$true] %s708_s29 }
  0x1d   :  { %735 = vmatmul.msk.bf16.vlgmr.msra.gmra.mxu0 %vm121_vm0, %v101_v10  ;;  %747 = vmatmul.msk.bf16.vlgmr.msra.gmra.mxu1 %vm121_vm0, %v163_v11 }
  0x1e   :  { %627 = vmatpush.msrb.mxu1 %v98_v7  ;;  %738 = vmatmul.msk.bf16.vlgmr.msra.gmra.mxu3 %vm121_vm0, %v104_v12 }
  0x1f   :  { %492 = vmatpush.msrb.mxu3 %v93_v5 }
  0x21   :  { %546 = vmatpush.msra.mxu3 %v95_v13 }
  0x2d   :  { %736 = vmatmul.msk.bf16.gmra.mxu0 %vm121_vm0, %v102_v14 }
  0x3d   :  { %737 = vmatmul.msk.bf16.gmra.mxu0 %vm121_vm0, %v103_v17 }
  0x9a   :  { %v143_v20 = vpop.f32.mrf.mxu0  ;;  %v196_v21 = vpop.f32.mrf.mxu1 }
  0x9b   :  { %v1057_v22 = vadd.f32 %v777_v18, %v196_v21  ;;  %v204_v23 = vadd.f32 %v1055_v19, %v143_v20 }
  0x9d   :  { %v213_v24 = vrot.slane %v1057_v22, 1  ;;  %v220_v25 = vperm.slane %v1057_v22, 0  ;;  %v218_v27 = vrot.slane %v1057_v22, 6  ;;  %v214_v37 = vrot.slane %v1057_v22, 2 }
  0x9e   :  { %v215_v47 = vrot.slane %v1057_v22, 3  ;;  %v219_v49 = vrot.slane %v1057_v22, 7  ;;  %v216_v63 = vrot.slane %v1057_v22, 4  ;;  %v217_v9 = vrot.slane %v1057_v22, 5 }
  0x9f   :  { %v236_v26 = vadd.f32 %v220_v25, %v204_v23  ;;  %v221_v28 = vperm.slane %v213_v24, 0  ;;  %v226_v34 = vperm.slane %v218_v27, 0  ;;  %v222_v41 = vperm.slane %v214_v37, 0 }
  0xa0   :  { %v223_v52 = vperm.slane %v215_v47, 0  ;;  %v227_v57 = vperm.slane %v219_v49, 0  ;;  %v224_v4 = vperm.slane %v216_v63, 0  ;;  %v225_v14 = vperm.slane %v217_v9, 0 }
  0xa1   :  { %779 = vtanh.f32 %v236_v26  ;;  %v158_v29 = vpop.f32.mrf.mxu3 }
  0xa2   :  { %v145_v30 = vpop.f32.mrf.mxu0  ;;  %v198_v31 = vpop.f32.mrf.mxu1  ;;  %v210_v33 = vadd.f32 %v1055_v19, %v158_v29 }
  0xa3   :  { %v205_v32 = vadd.f32 %v1055_v19, %v145_v30 }
  0xa4   :  { %v242_v39 = vadd.f32 %v226_v34, %v210_v33 }
  0xa5   :  { %v237_v36 = vadd.f32 %v221_v28, %v205_v32  ;;  %v296_v28 = vlaneseq }
  0xa7   :  { %v780_v38 = vpop.eup %779  ;;  %781 = vtanh.f32 %v237_v36  ;;  %v1096_v32 = vand.u32 127, %v296_v28 }
  0xa8   :  { %v256_v40 = vmul.f32 %v780_v38, %v1068_v35  ;;  %783 = vtanh.f32 %v242_v39 }
  0xa9   :  { %v160_v50 = vpop.f32.mrf.mxu3 }
  0xaa   :  { %v148_v42 = vpop.f32.mrf.mxu0  ;;  %v264_v43 = vsel %vm121_vm0, %v256_v40, 0.0  ;;  %v211_v56 = vadd.f32 %v1055_v19, %v160_v50 }
  0xab   :  { %v206_v44 = vadd.f32 %v1055_v19, %v148_v42  ;;  %265 = vadd.xlane.f32.xlu0 %v264_v43 }
  0xac   :  { %v243_v62 = vadd.f32 %v227_v57, %v211_v56 }
  0xad   :  { %v782_v45 = vpop.eup %781  ;;  %v238_v46 = vadd.f32 %v222_v41, %v206_v44 }
  0xae   :  { %v257_v48 = vmul.f32 %v782_v45, %v1068_v35  ;;  %v784_v51 = vpop.eup %783 }
  0xaf   :  { %785 = vtanh.f32 %v238_v46  ;;  %v262_v58 = vmul.f32 %v784_v51, %v1068_v35 }
  0xb0   :  { %v267_v54 = vsel %vm121_vm0, %v257_v48, 0.0 }
  0xb1   :  { %v282_v1 = vsel %vm121_vm0, %v262_v58, 0.0 }
  0xb2   :  { %v150_v53 = vpop.f32.mrf.mxu0 }
  0xb3   :  { %v207_v55 = vadd.f32 %v1055_v19, %v150_v53  ;;  %268 = vadd.xlane.f32.xlu0 %v267_v54 }
  0xb5   :  { %v786_v59 = vpop.eup %785  ;;  %v239_v60 = vadd.f32 %v223_v52, %v207_v55  ;;  %v975_v52 = vmov 0  }
  0xb6   :  { %v258_v61 = vmul.f32 %v786_v59, %v1068_v35  ;;  %775 = vset.pattern.permute.xlu2 %v975_v52  ;;  %774 = vset.pattern.permute.xlu1 %v975_v52 }
  0xb7   :  { %787 = vtanh.f32 %v239_v60  ;;  %773 = vset.pattern.permute.xlu0 %v975_v52 }
  0xb8   :  { %v270_v0 = vsel %vm121_vm0, %v258_v61, 0.0  ;;  %789 = vtanh.f32 %v243_v62 }
  0xb9   :  { %271 = vadd.xlane.f32.xlu1 %v270_v0 }
  0xba   :  { %v153_v2 = vpop.f32.mrf.mxu0 }
  0xbb   :  { %v208_v3 = vadd.f32 %v1055_v19, %v153_v2  ;;  %283 = vadd.xlane.f32.xlu0 %v282_v1 }
  0xbd   :  { %v788_v5 = vpop.eup %787  ;;  %v240_v6 = vadd.f32 %v224_v4, %v208_v3 }
  0xbe   :  { %v259_v7 = vmul.f32 %v788_v5, %v1068_v35  ;;  %v790_v11 = vpop.eup %789 }
  0xbf   :  { %791 = vtanh.f32 %v240_v6  ;;  %v263_v17 = vmul.f32 %v790_v11, %v1068_v35 }
  0xc0   :  { %v273_v10 = vsel %vm121_vm0, %v259_v7, 0.0 }
  0xc1   :  { %274 = vadd.xlane.f32.xlu1 %v273_v10  ;;  %v285_v23 = vsel %vm121_vm0, %v263_v17, 0.0 }
  0xc2   :  { %v155_v12 = vpop.f32.mrf.mxu0 }
  0xc3   :  { %v209_v13 = vadd.f32 %v1055_v19, %v155_v12 }
  0xc5   :  { %v792_v18 = vpop.eup %791  ;;  %v241_v20 = vadd.f32 %v225_v14, %v209_v13 }
  0xc6   :  { %v260_v21 = vmul.f32 %v792_v18, %v1068_v35 }
  0xc7   :  { %793 = vtanh.f32 %v241_v20 }
  0xc8   :  { %v276_v24 = vsel %vm121_vm0, %v260_v21, 0.0 }
  0xc9   :  { %286 = vadd.xlane.f32.xlu1 %v285_v23  ;;  %277 = vadd.xlane.f32.xlu2 %v276_v24 }
  0xcd   :  { %v794_v22 = vpop.eup %793 }
  0xce   :  { %v261_v25 = vmul.f32 %v794_v22, %v1068_v35 }
  0xd0   :  { %v279_v26 = vsel %vm121_vm0, %v261_v25, 0.0 }
  0xd1   :  { %280 = vadd.xlane.f32.xlu2 %v279_v26 }
 0x11e   :  { %v266_v27 = vpop.xlane.xlu0 %265 }
 0x11f   :  { %v298_v36 = vperm.slane %v266_v27, %v1096_v32 }
 0x126   :  { %v269_v30 = vpop.xlane.xlu0 %268 }
 0x127   :  { %v299_v33 = vperm.slane %v269_v30, %v1096_v32 }
 0x129   :  { %v307_v38 = vsel %vm306_vm1, %v299_v33, %v298_v36 }
 0x12c   :  { %v272_v19 = vpop.xlane.xlu1 %271 }
 0x12d   :  { %v300_v34 = vperm.slane %v272_v19, %v1096_v32 }
 0x12e   :  { %v284_v39 = vpop.xlane.xlu0 %283 }
 0x12f   :  { %v309_v40 = vsel %vm308_vm2, %v300_v34, %v307_v38  ;;  %v304_v45 = vperm.slane %v284_v39, %v1096_v32 }
 0x134   :  { %v275_v29 = vpop.xlane.xlu1 %274 }
 0x135   :  { %v301_v35 = vperm.slane %v275_v29, %v1096_v32 }
 0x137   :  { %v311_v43 = vsel %vm310_vm3, %v301_v35, %v309_v40 }
 0x13c   :  { %v278_v31 = vpop.xlane.xlu2 %277  ;;  %v287_v41 = vpop.xlane.xlu1 %286 }
 0x13d   :  { %v302_v37 = vperm.slane %v278_v31, %v1096_v32  ;;  %v305_v47 = vperm.slane %v287_v41, %v1096_v32 }
 0x13f   :  { %v313_v46 = vsel %vm312_vm4, %v302_v37, %v311_v43 }
 0x144   :  { %v281_v42 = vpop.xlane.xlu2 %280 }
 0x145   :  { %v303_v44 = vperm.slane %v281_v42, %v1096_v32 }
 0x147   :  { %v315_v48 = vsel %vm314_vm5, %v303_v44, %v313_v46 }
 0x148   :  { %v317_v49 = vsel %vm316_vm6, %v304_v45, %v315_v48 }
 0x149   :  { %v319_v50 = vsel %vm318_vm7, %v305_v47, %v317_v49 }
 0x14a   :  { %v322_v51 = vsel %vm321_vm8, %v319_v50, -inf }
 0x14b   :  { %323 = vmax.xlane.f32.xlu2 %v322_v51 }
 0x1be   :  { %v324_v53 = vpop.xlane.xlu2 %323 }
 0x1bf   :  { %v328_v54 = vperm.slane %v324_v53, 2  ;;  %v327_v55 = vperm.slane %v324_v53, 1  ;;  %v326_v56 = vperm.slane %v324_v53, 0  ;;  %v329_v60 = vperm.slane %v324_v53, 3 }
 0x1c0   :  { %v330_v61 = vperm.slane %v324_v53, 4  ;;  %v333_v62 = vperm.slane %v324_v53, 7  ;;  %v331_v6 = vperm.slane %v324_v53, 5  ;;  %v332_v9 = vperm.slane %v324_v53, 6 }
 0x1c1   :  { %v344_v57 = vsub.f32 %v272_v19, %v328_v54  ;;  %v343_v58 = vsub.f32 %v269_v30, %v327_v55  ;;  %v342_v59 = vsub.f32 %v266_v27, %v326_v56  ;;  %v345_v2 = vsub.f32 %v275_v29, %v329_v60 }
 0x1c2   :  { %v346_v3 = vsub.f32 %v278_v31, %v330_v61  ;;  %v349_v4 = vsub.f32 %v287_v41, %v333_v62  ;;  %v347_v14 = vsub.f32 %v281_v42, %v331_v6  ;;  %v348_v17 = vsub.f32 %v284_v39, %v332_v9 }
 0x1c3   :  { %v354_v63 = vmul.f32 1.442695, %v344_v57  ;;  %v352_v0 = vmul.f32 1.442695, %v343_v58  ;;  %v350_v1 = vmul.f32 1.442695, %v342_v59 }
 0x1c4   :  { %v356_v5 = vmul.f32 1.442695, %v345_v2  ;;  %v358_v7 = vmul.f32 1.442695, %v346_v3  ;;  %v364_v11 = vmul.f32 1.442695, %v349_v4 }
 0x1c5   :  { %795 = vpow2.f32 %v354_v63  ;;  %v360_v18 = vmul.f32 1.442695, %v347_v14  ;;  %v362_v20 = vmul.f32 1.442695, %v348_v17 }
 0x1c6   :  { %797 = vpow2.f32 %v352_v0 }
 0x1c7   :  { %799 = vpow2.f32 %v350_v1 }
 0x1c8   :  { %801 = vpow2.f32 %v356_v5 }
 0x1c9   :  { %803 = vpow2.f32 %v358_v7 }
 0x1ca   :  { %805 = vpow2.f32 %v364_v11 }
 0x1cb   :  { %v1114_v10 = vpop.eup %795  ;;  %807 = vpow2.f32 %v360_v18 }
 0x1cc   :  { %v798_v12 = vpop.eup %797  ;;  %381 = vperm.xlu2 %775, %v1114_v10   ;;  %809 = vpow2.f32 %v362_v20 }
 0x1cd   :  { %v800_v13 = vpop.eup %799  ;;  %378 = vperm.xlu1 %774, %v798_v12  }
 0x1ce   :  { %375 = vperm.xlu0 %773, %v800_v13   ;;  %v802_v21 = vpop.eup %801 }
 0x1cf   :  { %v804_v23 = vpop.eup %803 }
 0x1d0   :  { %v806_v24 = vpop.eup %805 }
 0x1d1   :  { %v808_v22 = vpop.eup %807 }
 0x1d2   :  { %v810_v25 = vpop.eup %809 }
 0x1d4   :  { %384 = vperm.xlu2 %775, %v802_v21  }
 0x1d5   :  { %387 = vperm.xlu1 %774, %v804_v23  }
 0x1d6   :  { %396 = vperm.xlu0 %773, %v806_v24  }
 0x1dc   :  { %390 = vperm.xlu2 %775, %v808_v22  }
 0x1dd   :  { %393 = vperm.xlu1 %774, %v810_v25  }
 0x226   :  { %v382_v26 = vpop.permute.xlu2 %381 }
 0x227   :  { %v400_v34 = vperm.slane %v382_v26, %v1096_v32 }
 0x22e   :  { %v385_v28 = vpop.permute.xlu2 %384 }
 0x22f   :  { %v401_v37 = vperm.slane %v385_v28, %v1096_v32 }
 0x236   :  { %v391_v38 = vpop.permute.xlu2 %390 }
 0x237   :  { %v403_v42 = vperm.slane %v391_v38, %v1096_v32 }
 0x23f   :  { %v379_v19 = vpop.permute.xlu1 %378 }
 0x240   :  { %v376_v27 = vpop.permute.xlu0 %375  ;;  %v399_v29 = vperm.slane %v379_v19, %v1096_v32 }
 0x241   :  { %v398_v30 = vperm.slane %v376_v27, %v1096_v32 }
 0x243   :  { %v406_v31 = vsel %vm306_vm1, %v399_v29, %v398_v30 }
 0x244   :  { %v407_v36 = vsel %vm308_vm2, %v400_v34, %v406_v31 }
 0x245   :  { %v408_v39 = vsel %vm310_vm3, %v401_v37, %v407_v36 }
 0x247   :  { %v388_v33 = vpop.permute.xlu1 %387 }
 0x248   :  { %v402_v35 = vperm.slane %v388_v33, %v1096_v32  ;;  %v397_v41 = vpop.permute.xlu0 %396 }
 0x249   :  { %v405_v45 = vperm.slane %v397_v41, %v1096_v32 }
 0x24a   :  { %v409_v40 = vsel %vm312_vm4, %v402_v35, %v408_v39 }
 0x24b   :  { %v410_v46 = vsel %vm314_vm5, %v403_v42, %v409_v40 }
 0x24f   :  { %v394_v43 = vpop.permute.xlu1 %393 }
 0x250   :  { %v404_v44 = vperm.slane %v394_v43, %v1096_v32 }
 0x252   :  { %v411_v47 = vsel %vm316_vm6, %v404_v44, %v410_v46 }
 0x253   :  { %v412_v48 = vsel %vm318_vm7, %v405_v45, %v411_v47 }
 0x254   :  { %v414_v49 = vsel %vm321_vm8, %v412_v48, 0.0 }
 0x255   :  { %415 = vadd.xlane.f32.xlu2 %v414_v49 }
 0x2c8   :  { %v416_v50 = vpop.xlane.xlu2 %415 }
 0x2c9   :  { %811 = vrcp.f32 %v416_v50 }
 0x2cf   :  { %v812_v51 = vpop.eup %811 }
 0x2d0   :  { %v420_v52 = vperm.slane %v812_v51, 1  ;;  %v419_v53 = vperm.slane %v812_v51, 0  ;;  %v422_v56 = vperm.slane %v812_v51, 3  ;;  %v421_v57 = vperm.slane %v812_v51, 2 }
 0x2d1   :  { %v424_v60 = vperm.slane %v812_v51, 5  ;;  %v423_v61 = vperm.slane %v812_v51, 4  ;;  %v425_v0 = vperm.slane %v812_v51, 6  ;;  %v426_v1 = vperm.slane %v812_v51, 7 }
 0x2d2   :  { %v436_v54 = vmul.f32 %v798_v12, %v420_v52  ;;  %v435_v55 = vmul.f32 %v800_v13, %v419_v53  ;;  %v438_v58 = vmul.f32 %v802_v21, %v422_v56  ;;  %v437_v59 = vmul.f32 %v1114_v10, %v421_v57 }
 0x2d3   :  { %v440_v62 = vmul.f32 %v808_v22, %v424_v60  ;;  %v439_v63 = vmul.f32 %v804_v23, %v423_v61  ;;  %v441_v2 = vmul.f32 %v810_v25, %v425_v0  ;;  %v442_v3 = vmul.f32 %v806_v24, %v426_v1 }
 0x2d4   :  { %472 = vperm.xlu0 %773, %v436_v54   ;;  %445 = vperm.xlu1 %774, %v435_v55  }
 0x2dc   :  { %526 = vperm.xlu0 %773, %v438_v58   ;;  %499 = vperm.xlu1 %774, %v437_v59  }
 0x2e4   :  { %580 = vperm.xlu0 %773, %v440_v62   ;;  %553 = vperm.xlu1 %774, %v439_v63  }
 0x2ec   :  { %607 = vperm.xlu0 %773, %v441_v2   ;;  %634 = vperm.xlu1 %774, %v442_v3  }
 0x346   :  { %v473_v4 = vpop.permute.xlu0 %472  ;;  %v446_v5 = vpop.permute.xlu1 %445 }
 0x347   :  { %v474_v6 = vperm.slane %v473_v4, %v1096_v32  ;;  %v447_v7 = vperm.slane %v446_v5, %v1096_v32 }
 0x349   :  { %748 = vmatmul.msk.f32.vlgmr.msra.gmra.mxu2 %vm321_vm8, %v447_v7  ;;  %749 = vmatmul.msk.f32.vlgmr.msrb.gmra.mxu3 %vm321_vm8, %v474_v6 }
 0x34a   :  { %573 = vmatpush.msra.mxu2 %v1042_v15  ;;  %600 = vmatpush.msrb.mxu3 %v1044_v16  ;;  %v683_v16 = vsel %vm306_vm1, %v474_v6, %v447_v7 }
 0x34e   :  { %v527_v9 = vpop.permute.xlu0 %526  ;;  %v500_v10 = vpop.permute.xlu1 %499 }
 0x34f   :  { %v528_v11 = vperm.slane %v527_v9, %v1096_v32  ;;  %v501_v12 = vperm.slane %v500_v10, %v1096_v32 }
 0x351   :  { %750 = vmatmul.msk.f32.vlgmr.msrb.gmra.mxu2 %vm321_vm8, %v501_v12  ;;  %751 = vmatmul.msk.f32.vlgmr.msra.gmra.mxu3 %vm321_vm8, %v528_v11  ;;  %v684_v18 = vsel %vm308_vm2, %v501_v12, %v683_v16 }
 0x352   :  { %654 = vmatpush.msrb.mxu2 %v1035_v8  ;;  %v685_v20 = vsel %vm310_vm3, %v528_v11, %v684_v18 }
 0x356   :  { %v581_v13 = vpop.permute.xlu0 %580  ;;  %v554_v14 = vpop.permute.xlu1 %553 }
 0x357   :  { %v582_v17 = vperm.slane %v581_v13, %v1096_v32  ;;  %v555_v15 = vperm.slane %v554_v14, %v1096_v32 }
 0x359   :  { %752 = vmatmul.msk.f32.vlgmr.msra.gmra.mxu2 %vm321_vm8, %v555_v15  ;;  %753 = vmatmul.msk.f32.vlgmr.msrb.gmra.mxu3 %vm321_vm8, %v582_v17  ;;  %v686_v21 = vsel %vm312_vm4, %v555_v15, %v685_v20 }
 0x35a   :  { %v687_v25 = vsel %vm314_vm5, %v582_v17, %v686_v21 }
 0x35e   :  { %v608_v23 = vpop.permute.xlu0 %607  ;;  %v635_v8 = vpop.permute.xlu1 %634 }
 0x35f   :  { %v609_v24 = vperm.slane %v608_v23, %v1096_v32  ;;  %v636_v22 = vperm.slane %v635_v8, %v1096_v32 }
 0x361   :  { %v688_v26 = vsel %vm316_vm6, %v609_v24, %v687_v25  ;;  %754 = vmatmul.msk.f32.vlgmr.msrb.gmra.mxu1 %vm321_vm8, %v609_v24  ;;  %755 = vmatmul.msk.f32.vlgmr.msrb.gmra.mxu2 %vm321_vm8, %v636_v22 }
 0x362   :  { %v689_v19 = vsel %vm318_vm7, %v636_v22, %v688_v26 }
 0x363   :  { %691 = vst.msk [vmem:[#allocation11] sm:$0xff] %vm321_vm8, %v689_v19 }
 0x364   :  { %713 = dma.vmem_to_hbm [thread:$0]  %s709_s29, 128, %s711_s10, [#allocation12]  }
 0x3cc   :  { %v467_v32 = vpop.f32.mrf.mxu2  ;;  %v494_v27 = vpop.f32.mrf.mxu3 }
 0x3cd   :  { %v667_v30 = vrot.slane %v494_v27, 7 }
 0x3cf   :  { %v668_v33 = vsel %vm306_vm1, %v667_v30, %v467_v32 }
 0x3d4   :  { %v521_v28 = vpop.f32.mrf.mxu2  ;;  %v548_v29 = vpop.f32.mrf.mxu3 }
 0x3d5   :  { %v669_v31 = vrot.slane %v521_v28, 6  ;;  %v671_v34 = vrot.slane %v548_v29, 5 }
 0x3d7   :  { %v670_v36 = vsel %vm308_vm2, %v669_v31, %v668_v33 }
 0x3d8   :  { %v672_v39 = vsel %vm310_vm3, %v671_v34, %v670_v36 }
 0x3dc   :  { %v575_v35 = vpop.f32.mrf.mxu2  ;;  %v602_v37 = vpop.f32.mrf.mxu3 }
 0x3dd   :  { %v673_v38 = vrot.slane %v575_v35, 4  ;;  %v675_v40 = vrot.slane %v602_v37, 3 }
 0x3de   :  { %v629_v41 = vpop.f32.mrf.mxu1 }
 0x3df   :  { %v674_v42 = vsel %vm312_vm4, %v673_v38, %v672_v39  ;;  %v677_v43 = vrot.slane %v629_v41, 2 }
 0x3e0   :  { %v676_v44 = vsel %vm314_vm5, %v675_v40, %v674_v42 }
 0x3e1   :  { %v678_v47 = vsel %vm316_vm6, %v677_v43, %v676_v44 }
 0x3e4   :  { %v656_v45 = vpop.f32.mrf.mxu2 }
 0x3e5   :  { %v679_v46 = vrot.slane %v656_v45, 1 }
 0x3e7   :  { %v680_v48 = vsel %vm318_vm7, %v679_v46, %v678_v47 }
 0x3e8   :  { %682 = vst.msk [vmem:[#allocation10] sm:$0xff] %vm121_vm0, %v680_v48 }
 0x3e9   :  { %702 = dma.vmem_to_hbm [thread:$0]  %s698_s11, 128, %s700_s14, [#allocation4]  }
 0x3ea   :  { %963 = dma.done.wait [#allocation4], 128  }
 0x3eb   :  { %964 = vsyncadd [#allocation4], 4294967168 }
 0x3ec   :  { %965 = dma.done.wait [#allocation12], 128  }
 0x3ed   :  { %966 = vsyncadd [#allocation12], 4294967168 }
 0x3ee   :  { %722 = vsyncpa [#allocation3], 1 }
 0x3ef   :  { %723 = vsyncpa [#allocation6], 1 }
 0x3f0   :  { %724 = vsyncpa [#allocation9], 1 }
 0x3f1   :  { %725 = vsyncpa [#allocation4], 1 }
 0x3f2   :  { %726 = vsyncpa [#allocation12], 1 }

</bundles_post_ra>
